<compile_context>
chip_gen: v6e
topology: v6e:2x2x1
jax: 0.10.0
libtpu: 0.0.40
codegen_flags: <defaults>
</compile_context>

<pallas_src>
import math
import functools

import jax
import jax.numpy as jnp
from jax.experimental import pallas as pl
from jax.experimental.pallas import tpu as pltpu

EPS = 1e-5
LEAKY_SLOPE = 0.01  # nn.LeakyReLU default negative_slope


def pna_kernel(h_ref, snorm_ref,
               w1_ref, wagg_ref, wpost_ref, beff_ref,
               wmix_ref, bmix_ref,
               out_ref, rb_sc, *, block_n):
    """Fused PNA tower + mixing network for one block of destination nodes.

    h_ref     : [N, F]    all node features (resident across grid steps)
    snorm_ref : [TN, 1]   graph-norm factor for this destination block
    w1        : [F, F]    pretrans src half ([in, out])
    wagg      : [4F, F]   scaler-folded posttrans blocks for [mean|max|min|std]
    wpost     : [F, F]    effective posttrans weight on raw node features
                          (= Wpost_h + W2 @ (Wc_mean+Wc_max+Wc_min), folded on host)
    beff      : [1, F]    bpre @ Wc_sum + bpost (folded on host)
    wmix/bmix : [F, F] / [1, F]   mixing Linear ([in, out]) + bias
    out_ref   : [TN, F]
    rb_sc     : [1, F]    VMEM scratch: row bias shared by every destination node
    """
    i = pl.program_id(0)

    # --- source-side work: done exactly once, result persists in VMEM scratch.
    @pl.when(i == 0)
    def _():
        # src[j] = h[j] @ W1  — the only destination-independent pretrans term.
        src = jnp.dot(h_ref[...], w1_ref[...], preferred_element_type=jnp.float32)  # [N, F]
        # Separable aggregators over neighbors j of M[i,j] = c[i] + src[j]:
        #   mean/max/min_j M = c[i] + mean/max/min_j(src);  Var_j M = Var_j(src).
        m = jnp.mean(src, axis=0, keepdims=True)                       # [1, F]
        mx = jnp.max(src, axis=0, keepdims=True)
        mn = jnp.min(src, axis=0, keepdims=True)
        msq = jnp.mean(src * src, axis=0, keepdims=True)
        s = jnp.sqrt(jnp.maximum(msq - m * m, 0.0) + EPS)              # std aggregator
        agg = jnp.concatenate([m, mx, mn, s], axis=1)                  # [1, 4F]
        rb_sc[...] = (jnp.dot(agg, wagg_ref[...],
                              preferred_element_type=jnp.float32)
                      + beff_ref[...])                                  # [1, F]

    # --- destination block path: two MXU matmuls per step.
    row0 = pl.multiple_of(i * block_n, block_n)
    h_dst = h_ref[pl.ds(row0, block_n), :]                              # [TN, F]

    post = (jnp.dot(h_dst, wpost_ref[...], preferred_element_type=jnp.float32)
            + rb_sc[...])
    post = post * snorm_ref[...]                                        # graph norm

    # dropout omitted (eval / p=0); mixing Linear + LeakyReLU + residual.
    mix = jnp.dot(post, wmix_ref[...], preferred_element_type=jnp.float32) + bmix_ref[...]
    act = jnp.where(mix >= 0, mix, LEAKY_SLOPE * mix)
    out_ref[...] = h_dst + act


def pna_layer_forward(h, snorm_n, params, avg_d, *, block_n=None):
    N, F = h.shape
    if block_n is None:
        block_n = min(N, 128)
    assert N % block_n == 0, "block_n must divide N"
    grid = (N // block_n,)

    # Fold the static degree scalers into the posttrans weight.
    # TODO(synk): specialized to a complete graph with self-loops (constant in-degree N);
    # a general adjacency would need per-node degrees and a sparse mailbox.
    amp = math.log(N + 1.0) / avg_d
    att = avg_d / math.log(N + 1.0)
    wpost = params["wpost"]                     # [13F, F], pre-transposed ([in, out])
    wp_h = wpost[0:F]                           # rows acting on the raw node features
    wc = [wpost[F + a * F: F + (a + 1) * F]
          + amp * wpost[5 * F + a * F: 5 * F + (a + 1) * F]
          + att * wpost[9 * F + a * F: 9 * F + (a + 1) * F]
          for a in range(4)]                    # mean, max, min, std (scaler-folded)
    wc_sum = wc[0] + wc[1] + wc[2]              # acts on the common dst term c
    # Fold the destination-dependent pretrans term into the posttrans weight:
    #   h@Wp_h + (h@W2 + bpre)@Wc_sum = h@(Wp_h + W2@Wc_sum) + bpre@Wc_sum
    wpost_eff = wp_h + params["w2"] @ wc_sum                           # [F, F]
    beff = params["bpre"] @ wc_sum + params["bpost"]                   # [1, F]
    wagg = jnp.concatenate(wc, axis=0)                                 # [4F, F]

    kernel = functools.partial(pna_kernel, block_n=block_n)

    # Advisory cost hint for XLA scheduling around the custom call.
    n_steps = grid[0]
    flops = 2 * N * F * F + 2 * 4 * F * F + 4 * N * F * F + 10 * N * F
    bytes_accessed = 4 * (2 * N * F + N + 7 * F * F + 3 * F)
    cost = pl.CostEstimate(flops=int(flops),
                           transcendentals=int(F),
                           bytes_accessed=int(bytes_accessed))

    return pl.pallas_call(
        kernel,
        out_shape=jax.ShapeDtypeStruct((N, F), jnp.float32),
        grid=grid,
        in_specs=[
            pl.BlockSpec((N, F), lambda i: (0, 0)),            # h (full, stays resident)
            pl.BlockSpec((block_n, 1), lambda i: (i, 0)),      # snorm_n block
            pl.BlockSpec((F, F), lambda i: (0, 0)),            # w1 (pretrans src half)
            pl.BlockSpec((4 * F, F), lambda i: (0, 0)),        # wagg (mean|max|min|std)
            pl.BlockSpec((F, F), lambda i: (0, 0)),            # wpost_eff
            pl.BlockSpec((1, F), lambda i: (0, 0)),            # beff
            pl.BlockSpec((F, F), lambda i: (0, 0)),            # wmix
            pl.BlockSpec((1, F), lambda i: (0, 0)),            # bmix
        ],
        out_specs=pl.BlockSpec((block_n, F), lambda i: (i, 0)),
        scratch_shapes=[pltpu.VMEM((1, F), jnp.float32)],      # shared row bias
        compiler_params=pltpu.CompilerParams(
            # "arbitrary": step 0 initializes the persistent scratch used by later steps.
            dimension_semantics=("arbitrary",)),
        cost_estimate=cost,
    )(h, snorm_n,
      params["w1"], wagg, wpost_eff, beff,
      params["wmix"], params["bmix"])


def pna_layer_reference(h, snorm_n, params, avg_d):
    """Pure-JAX reference mirroring the PyTorch forward (materialized mailbox)."""
    N, _ = h.shape
    src = h @ params["w1"]
    dst = h @ params["w2"]
    M = dst[:, None, :] + src[None, :, :] + params["bpre"]          # [Ndst, Nsrc, F]
    mean = M.mean(1)
    mx = M.max(1)
    mn = M.min(1)
    var = jnp.maximum((M * M).mean(1) - mean * mean, 0.0)
    std = jnp.sqrt(var + EPS)
    agg = jnp.concatenate([mean, mx, mn, std], 1)
    amp = math.log(N + 1.0) / avg_d
    att = avg_d / math.log(N + 1.0)
    scaled = jnp.concatenate([agg, agg * amp, agg * att], 1)
    post = jnp.concatenate([h, scaled], 1) @ params["wpost"] + params["bpost"]
    post = post * snorm_n
    mix = post @ params["wmix"] + params["bmix"]
    act = jnp.where(mix >= 0, mix, LEAKY_SLOPE * mix)
    return h + act


if __name__ == "__main__":
    N = 128        # nodes (complete graph with self-loops -> in-degree D = N)
    F = 128        # in_dim == out_dim (residual active), towers = 1; lane-dense output
    avg_d = 2.0    # scalar avg_d used by scale_amplification / attenuation
    BLOCK_N = 64   # 2 destination blocks -> exercises the persistent-scratch path

    key = jax.random.PRNGKey(0)
    ks = jax.random.split(key, 8)
    h = jax.random.normal(ks[0], (N, F), jnp.float32)
    snorm_n = jax.nn.sigmoid(jax.random.normal(ks[1], (N, 1), jnp.float32))

    # pretrans Linear(2F -> F): weight [F, 2F] split into src / dst halves,
    # stored pre-transposed as [F(in), F(out)] each.
    w_pre = 0.1 * jax.random.normal(ks[2], (F, 2 * F), jnp.float32)
    params = {
        "w1": w_pre[:, :F].T,                                            # src half
        "w2": w_pre[:, F:].T,                                            # dst half
        "bpre": 0.1 * jax.random.normal(ks[3], (1, F), jnp.float32),
        "wpost": (0.1 * jax.random.normal(ks[4], (F, 13 * F), jnp.float32)).T,
        "bpost": 0.1 * jax.random.normal(ks[5], (1, F), jnp.float32),
        "wmix": (0.1 * jax.random.normal(ks[6], (F, F), jnp.float32)).T,
        "bmix": 0.1 * jax.random.normal(ks[7], (1, F), jnp.float32),
    }

    out = jax.block_until_ready(
        pna_layer_forward(h, snorm_n, params, avg_d, block_n=BLOCK_N))
    ref = jax.block_until_ready(pna_layer_reference(h, snorm_n, params, avg_d))

    assert out.shape == (N, F) and out.dtype == jnp.float32
    assert jnp.allclose(out, ref, rtol=2e-3, atol=2e-3), "mismatch vs reference"

    # TODO(synk): dropout is identity here (eval / p=0).
    print("KERNEL_OK")
</pallas_src>

<mosaic_0001>
module attributes {stable_mosaic.version = 11 : i64} {
  func.func @pna_kernel(%arg0: i32, %arg1: memref<128x128xf32, #tpu.memory_space<vmem>>, %arg2: memref<64x1xf32, #tpu.memory_space<vmem>>, %arg3: memref<128x128xf32, #tpu.memory_space<vmem>>, %arg4: memref<512x128xf32, #tpu.memory_space<vmem>>, %arg5: memref<128x128xf32, #tpu.memory_space<vmem>>, %arg6: memref<1x128xf32, #tpu.memory_space<vmem>>, %arg7: memref<128x128xf32, #tpu.memory_space<vmem>>, %arg8: memref<1x128xf32, #tpu.memory_space<vmem>>, %arg9: memref<64x128xf32, #tpu.memory_space<vmem>>, %arg10: memref<1x128xf32, #tpu.memory_space<vmem>>) attributes {dimension_semantics = [#tpu.dimension_semantics<arbitrary>], iteration_bounds = array<i64: 2>, scalar_prefetch = 0 : i64, scratch_operands = 1 : i64, tpu.core_type = #tpu.core_type<tc>, window_params = [{pipeline_mode = #tpu.pipeline_mode<synchronous>, transform_indices = @transform_0, window_bounds = array<i64: 128, 128>}, {transform_indices = @transform_1, window_bounds = array<i64: 64, 1>}, {pipeline_mode = #tpu.pipeline_mode<synchronous>, transform_indices = @transform_2, window_bounds = array<i64: 128, 128>}, {pipeline_mode = #tpu.pipeline_mode<synchronous>, transform_indices = @transform_3, window_bounds = array<i64: 512, 128>}, {pipeline_mode = #tpu.pipeline_mode<synchronous>, transform_indices = @transform_4, window_bounds = array<i64: 128, 128>}, {pipeline_mode = #tpu.pipeline_mode<synchronous>, transform_indices = @transform_5, window_bounds = array<i64: 1, 128>}, {pipeline_mode = #tpu.pipeline_mode<synchronous>, transform_indices = @transform_6, window_bounds = array<i64: 128, 128>}, {pipeline_mode = #tpu.pipeline_mode<synchronous>, transform_indices = @transform_7, window_bounds = array<i64: 1, 128>}, {transform_indices = @transform_8, window_bounds = array<i64: 64, 128>}]} {
    %c0_i32 = arith.constant 0 : i32
    %0 = arith.cmpi eq, %arg0, %c0_i32 : i32
    %1 = arith.extui %0 : i1 to i32
    %c0_i32_0 = arith.constant 0 : i32
    %2 = arith.cmpi ne, %1, %c0_i32_0 : i32
    scf.if %2 {
      %c0_16 = arith.constant 0 : index
      %c0_17 = arith.constant 0 : index
      %27 = vector.load %arg1[%c0_16, %c0_17] : memref<128x128xf32, #tpu.memory_space<vmem>>, vector<128x128xf32>
      %c0_18 = arith.constant 0 : index
      %c0_19 = arith.constant 0 : index
      %28 = vector.load %arg3[%c0_18, %c0_19] : memref<128x128xf32, #tpu.memory_space<vmem>>, vector<128x128xf32>
      %cst_20 = arith.constant dense<0.000000e+00> : vector<128x128xf32>
      %29 = tpu.matmul %27, %28, %cst_20 {dimension_numbers = #tpu.dot_dimension_numbers<[1], [0], [0], [1], [0, 0, 1, 1], [], []>} : vector<128x128xf32>, vector<128x128xf32>, vector<128x128xf32> -> vector<128x128xf32>
      %cst_21 = arith.constant dense<0.000000e+00> : vector<128xf32>
      %30 = vector.multi_reduction <add>, %29, %cst_21 [0] : vector<128x128xf32> to vector<128xf32>
      %31 = vector.shape_cast %30 : vector<128xf32> to vector<1x128xf32>
      %cst_22 = arith.constant 1.280000e+02 : f32
      %32 = vector.broadcast %cst_22 : f32 to vector<1x128xf32>
      %33 = arith.divf %31, %32 : vector<1x128xf32>
      %cst_23 = arith.constant dense<0xFF800000> : vector<128xf32>
      %34 = vector.multi_reduction <maximumf>, %29, %cst_23 [0] : vector<128x128xf32> to vector<128xf32>
      %35 = vector.shape_cast %34 : vector<128xf32> to vector<1x128xf32>
      %cst_24 = arith.constant dense<0x7F800000> : vector<128xf32>
      %36 = vector.multi_reduction <minimumf>, %29, %cst_24 [0] : vector<128x128xf32> to vector<128xf32>
      %37 = vector.shape_cast %36 : vector<128xf32> to vector<1x128xf32>
      %38 = arith.mulf %29, %29 : vector<128x128xf32>
      %cst_25 = arith.constant dense<0.000000e+00> : vector<128xf32>
      %39 = vector.multi_reduction <add>, %38, %cst_25 [0] : vector<128x128xf32> to vector<128xf32>
      %40 = vector.shape_cast %39 : vector<128xf32> to vector<1x128xf32>
      %cst_26 = arith.constant 1.280000e+02 : f32
      %41 = vector.broadcast %cst_26 : f32 to vector<1x128xf32>
      %42 = arith.divf %40, %41 : vector<1x128xf32>
      %43 = arith.mulf %33, %33 : vector<1x128xf32>
      %44 = arith.subf %42, %43 : vector<1x128xf32>
      %cst_27 = arith.constant 0.000000e+00 : f32
      %45 = vector.broadcast %cst_27 : f32 to vector<1x128xf32>
      %46 = arith.maximumf %44, %45 : vector<1x128xf32>
      %cst_28 = arith.constant 9.99999974E-6 : f32
      %47 = vector.broadcast %cst_28 : f32 to vector<1x128xf32>
      %48 = arith.addf %46, %47 : vector<1x128xf32>
      %49 = math.sqrt %48 : vector<1x128xf32>
      %50 = tpu.concatenate %33, %35, %37, %49 in 1 : vector<1x128xf32>, vector<1x128xf32>, vector<1x128xf32>, vector<1x128xf32> -> vector<1x512xf32>
      %c0_29 = arith.constant 0 : index
      %c0_30 = arith.constant 0 : index
      %51 = vector.load %arg4[%c0_29, %c0_30] : memref<512x128xf32, #tpu.memory_space<vmem>>, vector<512x128xf32>
      %cst_31 = arith.constant dense<0.000000e+00> : vector<1x128xf32>
      %52 = tpu.matmul %50, %51, %cst_31 {dimension_numbers = #tpu.dot_dimension_numbers<[1], [0], [0], [1], [0, 0, 1, 1], [], []>} : vector<1x512xf32>, vector<512x128xf32>, vector<1x128xf32> -> vector<1x128xf32>
      %c0_32 = arith.constant 0 : index
      %c0_33 = arith.constant 0 : index
      %53 = vector.load %arg6[%c0_32, %c0_33] : memref<1x128xf32, #tpu.memory_space<vmem>>, vector<1x128xf32>
      %54 = arith.addf %52, %53 : vector<1x128xf32>
      %c0_34 = arith.constant 0 : index
      %c0_35 = arith.constant 0 : index
      %55 = vector.load %arg10[%c0_34, %c0_35] : memref<1x128xf32, #tpu.memory_space<vmem>>, vector<1x128xf32>
      tpu.vector_store %arg10[%c0_34, %c0_35], %54 {strides = array<i32>} : memref<1x128xf32, #tpu.memory_space<vmem>>, vector<1x128xf32>,
    } else {
    }
    %c64_i32 = arith.constant 64 : i32
    %3 = arith.muli %arg0, %c64_i32 : i32
    %4 = tpu.assume_multiple %3, 64 : i32
    %5 = arith.index_cast %4 : i32 to index
    %c0 = arith.constant 0 : index
    %6 = vector.load %arg1[%5, %c0] : memref<128x128xf32, #tpu.memory_space<vmem>>, vector<64x128xf32>
    %c0_1 = arith.constant 0 : index
    %c0_2 = arith.constant 0 : index
    %7 = vector.load %arg5[%c0_1, %c0_2] : memref<128x128xf32, #tpu.memory_space<vmem>>, vector<128x128xf32>
    %cst = arith.constant dense<0.000000e+00> : vector<64x128xf32>
    %8 = tpu.matmul %6, %7, %cst {dimension_numbers = #tpu.dot_dimension_numbers<[1], [0], [0], [1], [0, 0, 1, 1], [], []>} : vector<64x128xf32>, vector<128x128xf32>, vector<64x128xf32> -> vector<64x128xf32>
    %c0_3 = arith.constant 0 : index
    %c0_4 = arith.constant 0 : index
    %9 = vector.load %arg10[%c0_3, %c0_4] : memref<1x128xf32, #tpu.memory_space<vmem>>, vector<1x128xf32>
    %10 = vector.broadcast %9 : vector<1x128xf32> to vector<64x128xf32>
    %11 = arith.addf %8, %10 : vector<64x128xf32>
    %c0_5 = arith.constant 0 : index
    %c0_6 = arith.constant 0 : index
    %12 = vector.load %arg2[%c0_5, %c0_6] : memref<64x1xf32, #tpu.memory_space<vmem>>, vector<64x1xf32>
    %13 = vector.broadcast %12 : vector<64x1xf32> to vector<64x128xf32>
    %14 = arith.mulf %11, %13 : vector<64x128xf32>
    %c0_7 = arith.constant 0 : index
    %c0_8 = arith.constant 0 : index
    %15 = vector.load %arg7[%c0_7, %c0_8] : memref<128x128xf32, #tpu.memory_space<vmem>>, vector<128x128xf32>
    %cst_9 = arith.constant dense<0.000000e+00> : vector<64x128xf32>
    %16 = tpu.matmul %14, %15, %cst_9 {dimension_numbers = #tpu.dot_dimension_numbers<[1], [0], [0], [1], [0, 0, 1, 1], [], []>} : vector<64x128xf32>, vector<128x128xf32>, vector<64x128xf32> -> vector<64x128xf32>
    %c0_10 = arith.constant 0 : index
    %c0_11 = arith.constant 0 : index
    %17 = vector.load %arg8[%c0_10, %c0_11] : memref<1x128xf32, #tpu.memory_space<vmem>>, vector<1x128xf32>
    %18 = vector.broadcast %17 : vector<1x128xf32> to vector<64x128xf32>
    %19 = arith.addf %16, %18 : vector<64x128xf32>
    %cst_12 = arith.constant 0.000000e+00 : f32
    %20 = vector.broadcast %cst_12 : f32 to vector<64x128xf32>
    %21 = arith.cmpf oge, %19, %20 : vector<64x128xf32>
    %cst_13 = arith.constant 0.00999999977 : f32
    %22 = vector.broadcast %cst_13 : f32 to vector<64x128xf32>
    %23 = arith.mulf %22, %19 : vector<64x128xf32>
    %24 = arith.select %21, %19, %23 : vector<64x128xi1>, vector<64x128xf32>
    %25 = arith.addf %6, %24 : vector<64x128xf32>
    %c0_14 = arith.constant 0 : index
    %c0_15 = arith.constant 0 : index
    %26 = vector.load %arg9[%c0_14, %c0_15] : memref<64x128xf32, #tpu.memory_space<vmem>>, vector<64x128xf32>
    tpu.vector_store %arg9[%c0_14, %c0_15], %25 {strides = array<i32>} : memref<64x128xf32, #tpu.memory_space<vmem>>, vector<64x128xf32>,
    return
  }
  func.func @transform_0(%arg0: i32) -> (i32, i32) {
    %c0_i32 = arith.constant 0 : i32
    %c0_i32_0 = arith.constant 0 : i32
    %c0_i32_1 = arith.constant 0 : i32
    return %c0_i32, %c0_i32_0 : i32, i32
  }
  func.func @transform_1(%arg0: i32) -> (i32, i32) {
    %c0_i32 = arith.constant 0 : i32
    %c0_i32_0 = arith.constant 0 : i32
    return %arg0, %c0_i32 : i32, i32
  }
  func.func @transform_2(%arg0: i32) -> (i32, i32) {
    %c0_i32 = arith.constant 0 : i32
    %c0_i32_0 = arith.constant 0 : i32
    %c0_i32_1 = arith.constant 0 : i32
    return %c0_i32, %c0_i32_0 : i32, i32
  }
  func.func @transform_3(%arg0: i32) -> (i32, i32) {
    %c0_i32 = arith.constant 0 : i32
    %c0_i32_0 = arith.constant 0 : i32
    %c0_i32_1 = arith.constant 0 : i32
    return %c0_i32, %c0_i32_0 : i32, i32
  }
  func.func @transform_4(%arg0: i32) -> (i32, i32) {
    %c0_i32 = arith.constant 0 : i32
    %c0_i32_0 = arith.constant 0 : i32
    %c0_i32_1 = arith.constant 0 : i32
    return %c0_i32, %c0_i32_0 : i32, i32
  }
  func.func @transform_5(%arg0: i32) -> (i32, i32) {
    %c0_i32 = arith.constant 0 : i32
    %c0_i32_0 = arith.constant 0 : i32
    %c0_i32_1 = arith.constant 0 : i32
    return %c0_i32, %c0_i32_0 : i32, i32
  }
  func.func @transform_6(%arg0: i32) -> (i32, i32) {
    %c0_i32 = arith.constant 0 : i32
    %c0_i32_0 = arith.constant 0 : i32
    %c0_i32_1 = arith.constant 0 : i32
    return %c0_i32, %c0_i32_0 : i32, i32
  }
  func.func @transform_7(%arg0: i32) -> (i32, i32) {
    %c0_i32 = arith.constant 0 : i32
    %c0_i32_0 = arith.constant 0 : i32
    %c0_i32_1 = arith.constant 0 : i32
    return %c0_i32, %c0_i32_0 : i32, i32
  }
  func.func @transform_8(%arg0: i32) -> (i32, i32) {
    %c0_i32 = arith.constant 0 : i32
    %c0_i32_0 = arith.constant 0 : i32
    return %arg0, %c0_i32 : i32, i32
  }
}

</mosaic_0001>

<bundles_post_ra>
// kernel: tpu_custom_call.1
= control target key start
LH: loop header
LB: loop body
LE: loop exit
PB: predicated region body
PF: predicated region fallthrough
CT: control target
= control target key end

     0   :  { %13 = vsyncpa [#allocation4], 0  ;;  %s2361_s0 = inlined_call_operand.vmem [shape: f32[128,128], index: 0, kind: input, shape index: {}]   ;;  %s2362_s1 = inlined_call_operand.vmem [shape: f32[128,1], index: 1, kind: input, shape index: {}]   ;;  %s2363_s2 = inlined_call_operand.hbm [shape: f32[128,128], index: 2, kind: input, shape index: {}]   ;;  %s2364_s3 = inlined_call_operand.hbm [shape: f32[512,128], index: 3, kind: input, shape index: {}]   ;;  %s2365_s4 = inlined_call_operand.hbm [shape: f32[128,128], index: 4, kind: input, shape index: {}]   ;;  %s2366_s5 = inlined_call_operand.vmem [shape: f32[1,128], index: 5, kind: input, shape index: {}]   ;;  %s2367_s6 = inlined_call_operand.hbm [shape: f32[128,128], index: 6, kind: input, shape index: {}]   ;;  %s2368_s7 = inlined_call_operand.vmem [shape: f32[1,128], index: 7, kind: input, shape index: {}]   ;;  %s2369_s8 = inlined_call_operand.hbm [shape: f32[128,128], index: 8, kind: output, shape index: {}]  }
   0x1   :  { %14 = vsyncpa [#allocation7], 0 }
   0x2   :  { %15 = vsyncpa [#allocation10], 0 }
   0x3   :  { %16 = vsyncpa [#allocation5], 0 }
   0x4   :  { %18 = vsyncpa [#allocation5 + $0x1], 0  ;;  %s1989_s27 = smov 0   ;;  %s1991_s28 = smov 0  }
   0x5   :  { %s1993_s29 = smov 0   ;;  %s1995_s30 = smov 0  }
   0x6 LB: > { %s2010_s9 = sadd.s32 4294967295, %s1932_s30   ;;  %s1348_s10 = sadd.s32 4294967294, %s1932_s30   ;;  %s1932_s30 = sphi %s1995_s30, %s2378_s30   ;;  %s1928_s29 = sphi %s1993_s29, %s2377_s29   ;;  %s1924_s28 = sphi %s1991_s28, %s2376_s28   ;;  %s1920_s27 = sphi %s1989_s27, %s2375_s27  }
   0x7   : > { %s2014_s11 = sadd.s32 1, %s1932_s30   ;;  %s204_s12 = sadd.s32 1, %s1928_s29 }
   0x8   : > { %s201_s13 = ssub.s32 %s1932_s30, %s2014_s11  ;;  %p214_p0 = scmp.ne.s32.totalorder %s1928_s29, %s1924_s28 }
   0x9   : > { %p202_p1 = scmp.eq.s32.totalorder %s201_s13, 0  ;;  %p215_p2 = scmp.eq.s32.totalorder %s2010_s9, 1 }
   0xa   : > { %p220_p3 = scmp.ne.s32.totalorder %s1924_s28, %s1920_s27  ;;  %p221_p4 = scmp.eq.s32.totalorder %s1348_s10, 1 }
   0xb   : > { %s2025_s14 = scalar_select %p202_p1, %s1928_s29, %s204_s12  }
   0xc   : > { %p2027_p5 = por %p215_p2, %p214_p0  ;;  %p2031_p6 = por %p221_p4, %p220_p3 }
   0xd   : > { %p1349_p7 = scmp.ge.s32.totalorder %s1932_s30, 1  ;;  %p228_p8 = scmp.lt.s32.totalorder %s1932_s30, 3 }
   0xe   : > { %p1702_p10 = scmp.eq.s32.totalorder %s2010_s9, 0  ;;  %s1934_s18 = smov [#allocation6]  }
   0xf   : > { %p2039_p11 = pnand %p1349_p7, %p228_p8  ;;  %s256_s19 = sshll.u32 %s1934_s18, 4  ;;  %s257_s19 = int_to_ptr.vmem [resolvable:$true] %s256_s19 }
  0x10   : > { %s1935_s21 = smov [#allocation3]   ;;  %s1936_s23 = smov [#allocation8]  }
  0x11   : > { %p1685_p12 = pneg %p2039_p11  ;;  %s243_s22 = sshll.u32 %s1935_s21, 4  ;;  %s244_s22 = int_to_ptr.vmem [resolvable:$true] %s243_s22 }
  0x12   : > { %s269_s24 = sshll.u32 %s1936_s23, 4  ;;  %s1767_s25 = scalar_lea.vmem %s257_s19, 8192  ;;  %s270_s24 = int_to_ptr.vmem [resolvable:$true] %s269_s24 }
  0x13   : > { %p2047_p13 = pnand %p1702_p10, %p1685_p12  ;;  %p1768_p1 = scmp.ne.s32.totalorder %s257_s19, %s1767_s25 }
  0x14   : > { %p1775_p4 = scmp.lt.s32.totalorder %s257_s19, %s257_s19  ;;  %p1776_p7 = scmp.lt.s32.totalorder %s1767_s25, %s1767_s25 }
  0x15   : > { %p1758_p0 = pneg %p2047_p13 }
  0x16   : > { %p1777_p8 = por %p1776_p7, %p1775_p4 }
  0x17   : > { %p1770_p2 = pnand %p1768_p1, %p1758_p0 }
  0x19   : > { %p1771_p3 = pneg %p1770_p2 }
  0x1b   : > { %p1778_p12 = pnand %p1777_p8, %p1771_p3 }
  0x1d   : > { %1781 = shalt.err (!%p1778_p12)
}
  0x1e   : > { %s1937_s26 = smov 128   ;;  %s1938_s10 = smov 8  }
  0x1f   : > { %1691 = dma.hbm_to_vmem [thread:$0]  (!%p2047_p13), %s2364_s3, 8192, %s257_s19, [#allocation7], %s1937_s26, %s1937_s26, %s1938_s10  }
  0x20   : > { %s1793_s18 = scalar_lea.vmem %s244_s22, 2048  ;;  %p1801_p3 = scmp.lt.s32.totalorder %s244_s22, %s244_s22 }
  0x21   : > { %p1794_p1 = scmp.ne.s32.totalorder %s244_s22, %s1793_s18  ;;  %p1802_p7 = scmp.lt.s32.totalorder %s1793_s18, %s1793_s18 }
  0x23   : > { %p1796_p2 = pnand %p1794_p1, %p1758_p0  ;;  %p1803_p8 = por %p1802_p7, %p1801_p3 }
  0x25   : > { %p1797_p4 = pneg %p1796_p2 }
  0x27   : > { %p1804_p12 = pnand %p1803_p8, %p1797_p4 }
  0x29   : > { %1807 = shalt.err (!%p1804_p12)
}
  0x2a   : > { %1688 = dma.hbm_to_vmem [thread:$0]  (!%p2047_p13), %s2363_s2, 2048, %s244_s22, [#allocation4], %s1937_s26, %s1937_s26, %s1938_s10  }
  0x2b   : > { %s1819_s19 = scalar_lea.vmem %s270_s24, 2048  ;;  %p1827_p3 = scmp.lt.s32.totalorder %s270_s24, %s270_s24 }
  0x2c   : > { %p1820_p9 = scmp.ne.s32.totalorder %s270_s24, %s1819_s19  ;;  %p1828_p4 = scmp.lt.s32.totalorder %s1819_s19, %s1819_s19 }
  0x2e   : > { %p1822_p1 = pnand %p1820_p9, %p1758_p0  ;;  %p1829_p7 = por %p1828_p4, %p1827_p3 }
  0x30   : > { %p1823_p2 = pneg %p1822_p1 }
  0x32   : > { %p1830_p8 = pnand %p1829_p7, %p1823_p2 }
  0x34   : > { %1833 = shalt.err (!%p1830_p8)
}
  0x35   : > { %1694 = dma.hbm_to_vmem [thread:$0]  (!%p2047_p13), %s2365_s4, 2048, %s270_s24, [#allocation7], %s1937_s26, %s1937_s26, %s1938_s10  }
  0x36   : > { %s1939_s22 = smov [#allocation9]  }
  0x37   : > { %s285_s13 = sshll.u32 %s1939_s22, 4  ;;  %s286_s13 = int_to_ptr.vmem [resolvable:$true] %s285_s13 }
  0x38   : > { %s1845_s18 = scalar_lea.vmem %s286_s13, 2048  ;;  %p1853_p2 = scmp.lt.s32.totalorder %s286_s13, %s286_s13 }
  0x39   : > { %p1846_p9 = scmp.ne.s32.totalorder %s286_s13, %s1845_s18  ;;  %p1854_p3 = scmp.lt.s32.totalorder %s1845_s18, %s1845_s18 }
  0x3b   : > { %p1848_p12 = pnand %p1846_p9, %p1758_p0  ;;  %p1855_p4 = por %p1854_p3, %p1853_p2 }
  0x3d   : > { %p1849_p1 = pneg %p1848_p12 }
  0x3f   : > { %p1856_p7 = pnand %p1855_p4, %p1849_p1 }
  0x41   : > { %1859 = shalt.err (!%p1856_p7)
}
  0x42   : > { %1697 = dma.hbm_to_vmem [thread:$0]  (!%p2047_p13), %s2367_s6, 2048, %s286_s13, [#allocation10], %s1937_s26, %s1937_s26, %s1938_s10  }
  0x43   : > { %313 = sbr.rel (%p2039_p11) target bundleno = 1048 (0x418), region = 52 }
  0x48   : > { %1903 = dma.done.wait (%p1702_p10), [#allocation4], 2048  }
  0x49   : > { %1905 = vsyncadd (%p1702_p10), [#allocation4], 4294965248 }
  0x4a   : > { %1907 = dma.done.wait (%p1702_p10), [#allocation7], 10240  }
  0x4b   : > { %1909 = vsyncadd (%p1702_p10), [#allocation7], 4294957056 }
  0x4c   : > { %1911 = dma.done.wait (%p1702_p10), [#allocation10], 2048  }
  0x4d   : > { %1913 = vsyncadd (%p1702_p10), [#allocation10], 4294965248  ;;  %s356_s17 = sand.u32 1, %s1924_s28   ;;  %s1361_s20 = sshll.u32 %s2010_s9, 3 }
  0x4e   : > { %s1360_s26 = sshll.u32 %s356_s17, 6  ;;  %p360_p11 = scmp.lt.s32.totalorder %s1361_s20, 15 }
  0x4f   : > { %s2120_s12 = scalar_lea.vmem [#allocation11], %s1360_s26  ;;  %p2374_p13 = scmp.ne.s32.totalorder %s2010_s9, 0 }
  0x50   : > { %s2380_s20 = smov (!%p360_p11, %s1361_s20), 15 }
  0x51   : > { %s1362_s10 = sshll.u32 %s2380_s20, 3  ;;  %369 = sbr.rel (%p2374_p13) target bundleno = 587 (0x24b), region = 72 }
  0x52   : > { %s2118_s25 = scalar_lea.vmem %s2362_s1, %s1362_s10 }
  0x56   : > { %v401_v0 = vld [vmem:[#allocation3 + $0x78] sm:$0xff]  ;;  %v400_v1 = vld [vmem:[#allocation3 + $0x70] sm:$0xff]  ;;  %v399_v2 = vld [vmem:[#allocation3 + $0x68] sm:$0xff] }
  0x57   : > { %1523 = vmatprep.subr.mxu0 %v401_v0  ;;  %v398_v3 = vld [vmem:[#allocation3 + $0x60] sm:$0xff]  ;;  %v397_v5 = vld [vmem:[#allocation3 + $0x58] sm:$0xff]  ;;  %v396_v6 = vld [vmem:[#allocation3 + $0x50] sm:$0xff] }
  0x58   : > { %1524 = vmatpush3.msra.mxu0 %v401_v0  ;;  %v370_v4 = vld [vmem:[%s2361_s0] sm:$0xff]  ;;  %v395_v7 = vld [vmem:[#allocation3 + $0x48] sm:$0xff]  ;;  %v392_v10 = vld [vmem:[#allocation3 + $0x30] sm:$0xff] }
  0x59   : > { %1525 = vmatprep.subr.mxu0 %v400_v1  ;;  %1555 = vmatprep.mubr.f32.mxu0 %v370_v4  ;;  %v394_v8 = vld [vmem:[#allocation3 + $0x40] sm:$0xff]  ;;  %v393_v9 = vld [vmem:[#allocation3 + $0x38] sm:$0xff]  ;;  %v391_v11 = vld [vmem:[#allocation3 + $0x28] sm:$0xff] }
  0x5a   : > { %1526 = vmatpush3.msra.mxu0 %v400_v1  ;;  %v390_v12 = vld [vmem:[#allocation3 + $0x20] sm:$0xff]  ;;  %v389_v13 = vld [vmem:[#allocation3 + $0x18] sm:$0xff]  ;;  %v388_v14 = vld [vmem:[#allocation3 + $0x10] sm:$0xff] }
  0x5b   : > { %1527 = vmatprep.subr.mxu0 %v399_v2  ;;  %v387_v15 = vld [vmem:[#allocation3 + $0x8] sm:$0xff]  ;;  %v386_v16 = vld [vmem:[#allocation3] sm:$0xff]  ;;  %v373_v19 = vld [vmem:[%s2361_s0 + $0x18] sm:$0xff] }
  0x5c   : > { %1528 = vmatpush3.msra.mxu0 %v399_v2  ;;  %v371_v17 = vld [vmem:[%s2361_s0 + $0x8] sm:$0xff]  ;;  %v372_v18 = vld [vmem:[%s2361_s0 + $0x10] sm:$0xff]  ;;  %v374_v20 = vld [vmem:[%s2361_s0 + $0x20] sm:$0xff] }
  0x5d   : > { %1529 = vmatprep.subr.mxu0 %v398_v3  ;;  %v375_v21 = vld [vmem:[%s2361_s0 + $0x28] sm:$0xff]  ;;  %v376_v22 = vld [vmem:[%s2361_s0 + $0x30] sm:$0xff]  ;;  %v377_v23 = vld [vmem:[%s2361_s0 + $0x38] sm:$0xff] }
  0x5e   : > { %1530 = vmatpush3.msra.mxu0 %v398_v3  ;;  %v378_v24 = vld [vmem:[%s2361_s0 + $0x40] sm:$0xff]  ;;  %v379_v25 = vld [vmem:[%s2361_s0 + $0x48] sm:$0xff]  ;;  %v380_v26 = vld [vmem:[%s2361_s0 + $0x50] sm:$0xff] }
  0x5f   : > { %1531 = vmatprep.subr.mxu0 %v397_v5  ;;  %v381_v27 = vld [vmem:[%s2361_s0 + $0x58] sm:$0xff]  ;;  %v382_v28 = vld [vmem:[%s2361_s0 + $0x60] sm:$0xff]  ;;  %v383_v29 = vld [vmem:[%s2361_s0 + $0x68] sm:$0xff] }
  0x60   : > { %1532 = vmatpush3.msra.mxu0 %v397_v5  ;;  %v384_v30 = vld [vmem:[%s2361_s0 + $0x70] sm:$0xff]  ;;  %v385_v31 = vld [vmem:[%s2361_s0 + $0x78] sm:$0xff]  ;;  %v689_v38 = vld [vmem:[#allocation6 + $0xe0] sm:$0xff] }
  0x61   : > { %1533 = vmatprep.subr.mxu0 %v396_v6  ;;  %v692_v32 = vld [vmem:[#allocation6 + $0xf8] sm:$0xff]  ;;  %v691_v34 = vld [vmem:[#allocation6 + $0xf0] sm:$0xff]  ;;  %v690_v36 = vld [vmem:[#allocation6 + $0xe8] sm:$0xff] }
  0x62   : > { %1534 = vmatpush3.msra.mxu0 %v396_v6  ;;  %1405 = vmatprep.subr.mxu1 %v692_v32  ;;  %v676_v33 = vld [vmem:[#allocation6 + $0x78] sm:$0xff]  ;;  %v675_v35 = vld [vmem:[#allocation6 + $0x70] sm:$0xff]  ;;  %v674_v37 = vld [vmem:[#allocation6 + $0x68] sm:$0xff] }
  0x63   : > { %1535 = vmatprep.subr.mxu0 %v395_v7  ;;  %1406 = vmatpush3.msra.mxu1 %v676_v33  ;;  %v673_v39 = vld [vmem:[#allocation6 + $0x60] sm:$0xff]  ;;  %v688_v40 = vld [vmem:[#allocation6 + $0xd8] sm:$0xff]  ;;  %v687_v42 = vld [vmem:[#allocation6 + $0xd0] sm:$0xff] }
  0x64   : > { %1536 = vmatpush3.msra.mxu0 %v395_v7  ;;  %1407 = vmatprep.subr.mxu1 %v691_v34  ;;  %v672_v41 = vld [vmem:[#allocation6 + $0x58] sm:$0xff]  ;;  %v671_v43 = vld [vmem:[#allocation6 + $0x50] sm:$0xff]  ;;  %v686_v44 = vld [vmem:[#allocation6 + $0xc8] sm:$0xff] }
  0x65   : > { %1537 = vmatprep.subr.mxu0 %v394_v8  ;;  %1408 = vmatpush3.msra.mxu1 %v675_v35  ;;  %v670_v45 = vld [vmem:[#allocation6 + $0x48] sm:$0xff]  ;;  %v685_v46 = vld [vmem:[#allocation6 + $0xc0] sm:$0xff]  ;;  %v684_v48 = vld [vmem:[#allocation6 + $0xb8] sm:$0xff] }
  0x66   : > { %1538 = vmatpush3.msra.mxu0 %v394_v8  ;;  %1409 = vmatprep.subr.mxu1 %v690_v36  ;;  %v669_v47 = vld [vmem:[#allocation6 + $0x40] sm:$0xff]  ;;  %v668_v49 = vld [vmem:[#allocation6 + $0x38] sm:$0xff]  ;;  %v683_v50 = vld [vmem:[#allocation6 + $0xb0] sm:$0xff] }
  0x67   : > { %1539 = vmatprep.subr.mxu0 %v393_v9  ;;  %1410 = vmatpush3.msra.mxu1 %v674_v37  ;;  %v667_v51 = vld [vmem:[#allocation6 + $0x30] sm:$0xff]  ;;  %v682_v52 = vld [vmem:[#allocation6 + $0xa8] sm:$0xff]  ;;  %v681_v54 = vld [vmem:[#allocation6 + $0xa0] sm:$0xff] }
  0x68   : > { %1540 = vmatpush3.msra.mxu0 %v393_v9  ;;  %1411 = vmatprep.subr.mxu1 %v689_v38  ;;  %v666_v53 = vld [vmem:[#allocation6 + $0x28] sm:$0xff]  ;;  %v665_v55 = vld [vmem:[#allocation6 + $0x20] sm:$0xff]  ;;  %v680_v56 = vld [vmem:[#allocation6 + $0x98] sm:$0xff] }
  0x69   : > { %1541 = vmatprep.subr.mxu0 %v392_v10  ;;  %1412 = vmatpush3.msra.mxu1 %v673_v39  ;;  %v664_v57 = vld [vmem:[#allocation6 + $0x18] sm:$0xff]  ;;  %v679_v59 = vld [vmem:[#allocation6 + $0x90] sm:$0xff]  ;;  %v678_v63 = vld [vmem:[#allocation6 + $0x88] sm:$0xff] }
  0x6a   : > { %1542 = vmatpush3.msra.mxu0 %v392_v10  ;;  %1413 = vmatprep.subr.mxu1 %v688_v40  ;;  %v724_v58 = vld [vmem:[#allocation6 + $0x1f8] sm:$0xff]  ;;  %v663_v61 = vld [vmem:[#allocation6 + $0x10] sm:$0xff]  ;;  %v662_v1 = vld [vmem:[#allocation6 + $0x8] sm:$0xff] }
  0x6b   : > { %1543 = vmatprep.subr.mxu0 %v391_v11  ;;  %1414 = vmatpush3.msra.mxu1 %v672_v41  ;;  %v708_v60 = vld [vmem:[#allocation6 + $0x178] sm:$0xff]  ;;  %v723_v62 = vld [vmem:[#allocation6 + $0x1f0] sm:$0xff]  ;;  %v722_v2 = vld [vmem:[#allocation6 + $0x1e8] sm:$0xff] }
  0x6c   : > { %1544 = vmatpush3.msra.mxu0 %v391_v11  ;;  %1415 = vmatprep.subr.mxu1 %v687_v42  ;;  %v707_v0 = vld [vmem:[#allocation6 + $0x170] sm:$0xff]  ;;  %v677_v3 = vld [vmem:[#allocation6 + $0x80] sm:$0xff]  ;;  %v706_v4 = vld [vmem:[#allocation6 + $0x168] sm:$0xff] }
  0x6d   : > { %1545 = vmatprep.subr.mxu0 %v390_v12  ;;  %1416 = vmatpush3.msra.mxu1 %v671_v43  ;;  %v661_v5 = vld [vmem:[#allocation6] sm:$0xff]  ;;  %v720_v8 = vld [vmem:[#allocation6 + $0x1d8] sm:$0xff]  ;;  %v719_v10 = vld [vmem:[#allocation6 + $0x1d0] sm:$0xff] }
  0x6e   : > { %1546 = vmatpush3.msra.mxu0 %v390_v12  ;;  %1417 = vmatprep.subr.mxu1 %v686_v44  ;;  %v721_v6 = vld [vmem:[#allocation6 + $0x1e0] sm:$0xff]  ;;  %v704_v9 = vld [vmem:[#allocation6 + $0x158] sm:$0xff]  ;;  %v703_v11 = vld [vmem:[#allocation6 + $0x150] sm:$0xff] }
  0x6f   : > { %1547 = vmatprep.subr.mxu0 %v389_v13  ;;  %1418 = vmatpush3.msra.mxu1 %v670_v45  ;;  %v705_v7 = vld [vmem:[#allocation6 + $0x160] sm:$0xff]  ;;  %v718_v12 = vld [vmem:[#allocation6 + $0x1c8] sm:$0xff] }
  0x70   : > { %1548 = vmatpush3.msra.mxu0 %v389_v13  ;;  %1419 = vmatprep.subr.mxu1 %v685_v46  ;;  %v702_v13 = vld [vmem:[#allocation6 + $0x148] sm:$0xff] }
  0x71   : > { %1549 = vmatprep.subr.mxu0 %v388_v14  ;;  %1420 = vmatpush3.msra.mxu1 %v669_v47 }
  0x72   : > { %1550 = vmatpush3.msra.mxu0 %v388_v14  ;;  %1421 = vmatprep.subr.mxu1 %v684_v48  ;;  %v717_v14 = vld [vmem:[#allocation6 + $0x1c0] sm:$0xff] }
  0x73   : > { %1551 = vmatprep.subr.mxu0 %v387_v15  ;;  %1422 = vmatpush3.msra.mxu1 %v668_v49 }
  0x74   : > { %1552 = vmatpush3.msra.mxu0 %v387_v15  ;;  %1423 = vmatprep.subr.mxu1 %v683_v50  ;;  %v701_v15 = vld [vmem:[#allocation6 + $0x140] sm:$0xff] }
  0x75   : > { %1553 = vmatprep.subr.mxu0 %v386_v16  ;;  %1424 = vmatpush3.msra.mxu1 %v667_v51 }
  0x76   : > { %1554 = vmatpush3.msra.mxu0 %v386_v16  ;;  %1425 = vmatprep.subr.mxu1 %v682_v52  ;;  %v716_v16 = vld [vmem:[#allocation6 + $0x1b8] sm:$0xff] }
  0x77   : > { %1556 = vmatmul.mubr.f32.vlgmr.msra.gmra.mxu0 %v371_v17  ;;  %1426 = vmatpush3.msra.mxu1 %v666_v53  ;;  %v700_v17 = vld [vmem:[#allocation6 + $0x138] sm:$0xff] }
  0x78   : > { %1558 = vmatprep.mubr.f32.mxu0 %v372_v18  ;;  %1427 = vmatprep.subr.mxu1 %v681_v54  ;;  %v715_v18 = vld [vmem:[#allocation6 + $0x1b0] sm:$0xff] }
  0x79   : > { %1428 = vmatpush3.msra.mxu1 %v665_v55  ;;  %1440 = vmatprep.subr.mxu0 %v724_v58 }
  0x7a   : > { %1429 = vmatprep.subr.mxu1 %v680_v56  ;;  %1441 = vmatpush3.msra.mxu0 %v708_v60 }
  0x7b   : > { %1559 = vmatmul.mubr.f32.gmra.mxu0 %v373_v19  ;;  %1430 = vmatpush3.msra.mxu1 %v664_v57  ;;  %v699_v19 = vld [vmem:[#allocation6 + $0x130] sm:$0xff] }
  0x7c   : > { %1561 = vmatprep.mubr.f32.mxu0 %v374_v20  ;;  %1431 = vmatprep.subr.mxu1 %v679_v59  ;;  %v714_v20 = vld [vmem:[#allocation6 + $0x1a8] sm:$0xff] }
  0x7d   : > { %1432 = vmatpush3.msra.mxu1 %v663_v61  ;;  %1442 = vmatprep.subr.mxu0 %v723_v62 }
  0x7e   : > { %1433 = vmatprep.subr.mxu1 %v678_v63  ;;  %1443 = vmatpush3.msra.mxu0 %v707_v0 }
  0x7f   : > { %1562 = vmatmul.mubr.f32.gmra.mxu0 %v375_v21  ;;  %1434 = vmatpush3.msra.mxu1 %v662_v1  ;;  %v698_v21 = vld [vmem:[#allocation6 + $0x128] sm:$0xff] }
  0x80   : > { %1564 = vmatprep.mubr.f32.mxu0 %v376_v22  ;;  %1444 = vmatprep.subr.mxu0 %v722_v2  ;;  %v713_v22 = vld [vmem:[#allocation6 + $0x1a0] sm:$0xff] }
  0x81   : > { %1435 = vmatprep.subr.mxu1 %v677_v3  ;;  %1445 = vmatpush3.msra.mxu0 %v706_v4 }
  0x82   : > { %1436 = vmatpush3.msra.mxu1 %v661_v5  ;;  %1446 = vmatprep.subr.mxu0 %v721_v6 }
  0x83   : > { %1565 = vmatmul.mubr.f32.gmra.mxu0 %v377_v23  ;;  %v697_v23 = vld [vmem:[#allocation6 + $0x120] sm:$0xff] }
  0x84   : > { %1567 = vmatprep.mubr.f32.mxu0 %v378_v24  ;;  %1447 = vmatpush3.msra.mxu0 %v705_v7  ;;  %v712_v24 = vld [vmem:[#allocation6 + $0x198] sm:$0xff] }
  0x85   : > { %1448 = vmatprep.subr.mxu0 %v720_v8 }
  0x86   : > { %1449 = vmatpush3.msra.mxu0 %v704_v9 }
  0x87   : > { %1568 = vmatmul.mubr.f32.gmra.mxu0 %v379_v25  ;;  %1450 = vmatprep.subr.mxu0 %v719_v10  ;;  %v696_v25 = vld [vmem:[#allocation6 + $0x118] sm:$0xff] }
  0x88   : > { %1570 = vmatprep.mubr.f32.mxu0 %v380_v26  ;;  %1451 = vmatpush3.msra.mxu0 %v703_v11  ;;  %v711_v26 = vld [vmem:[#allocation6 + $0x190] sm:$0xff] }
  0x89   : > { %1452 = vmatprep.subr.mxu0 %v718_v12 }
  0x8a   : > { %1453 = vmatpush3.msra.mxu0 %v702_v13 }
  0x8b   : > { %1571 = vmatmul.mubr.f32.gmra.mxu0 %v381_v27  ;;  %1454 = vmatprep.subr.mxu0 %v717_v14  ;;  %v695_v27 = vld [vmem:[#allocation6 + $0x110] sm:$0xff] }
  0x8c   : > { %1573 = vmatprep.mubr.f32.mxu0 %v382_v28  ;;  %1455 = vmatpush3.msra.mxu0 %v701_v15  ;;  %v710_v28 = vld [vmem:[#allocation6 + $0x188] sm:$0xff] }
  0x8d   : > { %1456 = vmatprep.subr.mxu0 %v716_v16 }
  0x8e   : > { %1457 = vmatpush3.msra.mxu0 %v700_v17 }
  0x8f   : > { %1574 = vmatmul.mubr.f32.gmra.mxu0 %v383_v29  ;;  %1458 = vmatprep.subr.mxu0 %v715_v18  ;;  %v694_v29 = vld [vmem:[#allocation6 + $0x108] sm:$0xff] }
  0x90   : > { %1576 = vmatprep.mubr.f32.mxu0 %v384_v30  ;;  %1459 = vmatpush3.msra.mxu0 %v699_v19  ;;  %v709_v30 = vld [vmem:[#allocation6 + $0x180] sm:$0xff] }
  0x91   : > { %1460 = vmatprep.subr.mxu0 %v714_v20 }
  0x92   : > { %1461 = vmatpush3.msra.mxu0 %v698_v21 }
  0x93   : > { %1577 = vmatmul.mubr.f32.gmra.mxu0 %v385_v31  ;;  %1462 = vmatprep.subr.mxu0 %v713_v22  ;;  %v693_v31 = vld [vmem:[#allocation6 + $0x100] sm:$0xff] }
  0x94   : > { %1463 = vmatpush3.msra.mxu0 %v697_v23 }
  0x95   : > { %1464 = vmatprep.subr.mxu0 %v712_v24 }
  0x96   : > { %1465 = vmatpush3.msra.mxu0 %v696_v25 }
  0x97   : > { %1466 = vmatprep.subr.mxu0 %v711_v26 }
  0x98   : > { %1467 = vmatpush3.msra.mxu0 %v695_v27 }
  0x99   : > { %1468 = vmatprep.subr.mxu0 %v710_v28 }
  0x9a   : > { %1469 = vmatpush3.msra.mxu0 %v694_v29 }
  0x9b   : > { %1470 = vmatprep.subr.mxu0 %v709_v30 }
  0x9c   : > { %1471 = vmatpush3.msra.mxu0 %v693_v31 }
 0x137   : > { %v2172_v32 = vpop.f32.mrf.mxu0 }
 0x138   : > { %v613_v36 = vmul.f32 %v2172_v32, %v2172_v32 }
 0x139   : > { %v2174_v33 = vpop.f32.mrf.mxu0 }
 0x13a   : > { %v612_v34 = vmul.f32 %v2174_v33, %v2174_v33  ;;  %v547_v37 = vadd.f32 %v2172_v32, %v2174_v33 }
 0x13b   : > { %v2178_v35 = vpop.f32.mrf.mxu0 }
 0x13c   : > { %v628_v39 = vadd.f32 %v613_v36, %v612_v34  ;;  %v615_v43 = vmul.f32 %v2178_v35, %v2178_v35 }
 0x13d   : > { %v2184_v38 = vpop.f32.mrf.mxu0 }
 0x13e   : > { %v548_v40 = vadd.f32 %v547_v37, %v2184_v38  ;;  %v614_v41 = vmul.f32 %v2184_v38, %v2184_v38 }
 0x13f   : > { %v2189_v42 = vpop.f32.mrf.mxu0 }
 0x140   : > { %v629_v44 = vadd.f32 %v628_v39, %v614_v41  ;;  %v549_v46 = vadd.f32 %v2178_v35, %v548_v40  ;;  %v617_v51 = vmul.f32 %v2189_v42, %v2189_v42  ;;  %v571_v14 = vmax.f32 %v2172_v32, %v2189_v42 }
 0x141   : > { %v2193_v45 = vpop.f32.mrf.mxu0 }
 0x142   : > { %v616_v47 = vmul.f32 %v2193_v45, %v2193_v45  ;;  %v630_v48 = vadd.f32 %v629_v44, %v615_v43  ;;  %v550_v49 = vadd.f32 %v549_v46, %v2193_v45  ;;  %v570_v11 = vmax.f32 %v2174_v33, %v2193_v45 }
 0x143   : > { %v2199_v50 = vpop.f32.mrf.mxu0 }
 0x144   : > { %v631_v52 = vadd.f32 %v630_v48, %v616_v47  ;;  %v551_v54 = vadd.f32 %v2189_v42, %v550_v49  ;;  %v619_v59 = vmul.f32 %v2199_v50, %v2199_v50  ;;  %v573_v15 = vmax.f32 %v2178_v35, %v2199_v50 }
 0x145   : > { %v2203_v53 = vpop.f32.mrf.mxu0 }
 0x146   : > { %v618_v55 = vmul.f32 %v2203_v53, %v2203_v53  ;;  %v632_v56 = vadd.f32 %v631_v52, %v617_v51  ;;  %v552_v57 = vadd.f32 %v551_v54, %v2203_v53  ;;  %v572_v18 = vmax.f32 %v2184_v38, %v2203_v53 }
 0x147   : > { %v2209_v58 = vpop.f32.mrf.mxu0 }
 0x148   : > { %v633_v60 = vadd.f32 %v632_v56, %v618_v55  ;;  %v553_v62 = vadd.f32 %v2199_v50, %v552_v57  ;;  %v621_v3 = vmul.f32 %v2209_v58, %v2209_v58  ;;  %v575_v22 = vmax.f32 %v571_v14, %v2209_v58 }
 0x149   : > { %v508_v61 = vpop.f32.mrf.mxu0  ;;  %v593_v57 = vmin.f32 %v2184_v38, %v2203_v53 }
 0x14a   : > { %v620_v63 = vmul.f32 %v508_v61, %v508_v61  ;;  %v634_v0 = vadd.f32 %v633_v60, %v619_v59  ;;  %v554_v1 = vadd.f32 %v553_v62, %v508_v61  ;;  %v574_v19 = vmax.f32 %v570_v11, %v508_v61 }
 0x14b   : > { %v1572_v2 = vpop.f32.mrf.mxu0  ;;  %v591_v62 = vmin.f32 %v2174_v33, %v2193_v45 }
 0x14c   : > { %v635_v4 = vadd.f32 %v634_v0, %v620_v63  ;;  %v555_v6 = vadd.f32 %v2209_v58, %v554_v1  ;;  %v623_v12 = vmul.f32 %v1572_v2, %v1572_v2  ;;  %v577_v23 = vmax.f32 %v573_v15, %v1572_v2 }
 0x14d   : > { %v518_v5 = vpop.f32.mrf.mxu0  ;;  %v594_v0 = vmin.f32 %v2178_v35, %v2199_v50 }
 0x14e   : > { %v622_v7 = vmul.f32 %v518_v5, %v518_v5  ;;  %v636_v8 = vadd.f32 %v635_v4, %v621_v3  ;;  %v556_v9 = vadd.f32 %v555_v6, %v518_v5  ;;  %v576_v26 = vmax.f32 %v572_v18, %v518_v5 }
 0x14f   : > { %v2217_v10 = vpop.f32.mrf.mxu0  ;;  %v597_v1 = vmin.f32 %v593_v57, %v518_v5  ;;  %v592_v6 = vmin.f32 %v2172_v32, %v2189_v42 }
 0x150   : > { %v637_v13 = vadd.f32 %v636_v8, %v622_v7  ;;  %v557_v17 = vadd.f32 %v1572_v2, %v556_v9  ;;  %v625_v27 = vmul.f32 %v2217_v10, %v2217_v10  ;;  %v579_v30 = vmax.f32 %v575_v22, %v2217_v10 }
 0x151   : > { %v528_v16 = vpop.f32.mrf.mxu0  ;;  %v595_v7 = vmin.f32 %v591_v62, %v508_v61  ;;  %v598_v9 = vmin.f32 %v594_v0, %v1572_v2 }
 0x152   : > { %v624_v20 = vmul.f32 %v528_v16, %v528_v16  ;;  %v638_v21 = vadd.f32 %v637_v13, %v623_v12  ;;  %v558_v24 = vadd.f32 %v557_v17, %v528_v16  ;;  %v578_v28 = vmax.f32 %v574_v19, %v528_v16 }
 0x153   : > { %v1578_v25 = vpop.f32.mrf.mxu0  ;;  %v596_v12 = vmin.f32 %v592_v6, %v2209_v58  ;;  %v599_v33 = vmin.f32 %v595_v7, %v528_v16 }
 0x154   : > { %v639_v29 = vadd.f32 %v638_v21, %v624_v20  ;;  %v559_v34 = vadd.f32 %v2217_v10, %v558_v24  ;;  %v581_v36 = vmax.f32 %v577_v23, %v1578_v25  ;;  %v582_v43 = vmax.f32 %v578_v28, %v579_v30 }
 0x155   : > { %v538_v31 = vpop.f32.mrf.mxu0  ;;  %v627_v44 = vmul.f32 %v1578_v25, %v1578_v25  ;;  %v602_v45 = vmin.f32 %v598_v9, %v1578_v25  ;;  %v600_v50 = vmin.f32 %v596_v12, %v2217_v10 }
 0x156   : > { %v580_v37 = vmax.f32 %v576_v26, %v538_v31  ;;  %v626_v39 = vmul.f32 %v538_v31, %v538_v31  ;;  %v640_v40 = vadd.f32 %v639_v29, %v625_v27  ;;  %v560_v41 = vadd.f32 %v559_v34, %v538_v31 }
 0x157   : > { %v601_v11 = vmin.f32 %v597_v1, %v538_v31  ;;  %v603_v42 = vmin.f32 %v599_v33, %v600_v50 }
 0x158   : > { %v583_v46 = vmax.f32 %v580_v37, %v581_v36  ;;  %v641_v47 = vadd.f32 %v640_v40, %v626_v39  ;;  %v561_v48 = vadd.f32 %v1578_v25, %v560_v41  ;;  %v725_v37 = vld [vmem:[%s2366_s5] sm:$0x1] }
 0x159   : > { %v604_v5 = vmin.f32 %v601_v11, %v602_v45 }
 0x15a   : > { %v642_v49 = vadd.f32 %v641_v47, %v627_v44  ;;  %v584_v51 = vmax.f32 %v582_v43, %v583_v46  ;;  %v562_v52 = vrot.slane %v561_v48, 4 }
 0x15b   : > { %v605_v19 = vmin.f32 %v603_v42, %v604_v5 }
 0x15c   : > { %v643_v54 = vrot.slane %v642_v49, 4  ;;  %v585_v55 = vrot.slane %v584_v51, 4  ;;  %v563_v56 = vadd.f32 %v562_v52, %v561_v48 }
 0x15d   : > { %v606_v21 = vrot.slane %v605_v19, 4 }
 0x15e   : > { %v644_v59 = vadd.f32 %v643_v54, %v642_v49  ;;  %v586_v60 = vmax.f32 %v584_v51, %v585_v55  ;;  %v564_v63 = vrot.slane %v563_v56, 2 }
 0x15f   : > { %v607_v22 = vmin.f32 %v605_v19, %v606_v21 }
 0x160   : > { %v645_v3 = vrot.slane %v644_v59, 2  ;;  %v587_v4 = vrot.slane %v586_v60, 2  ;;  %v565_v8 = vadd.f32 %v564_v63, %v563_v56 }
 0x161   : > { %v608_v23 = vrot.slane %v607_v22, 2 }
 0x162   : > { %v588_v38 = vmax.f32 %v586_v60, %v587_v4  ;;  %v646_v53 = vadd.f32 %v645_v3, %v644_v59  ;;  %v566_v13 = vrot.slane %v565_v8, 1 }
 0x163   : > { %v609_v24 = vmin.f32 %v607_v22, %v608_v23 }
 0x164   : > { %v589_v14 = vrot.slane %v588_v38, 1  ;;  %v647_v15 = vrot.slane %v646_v53, 1  ;;  %v567_v35 = vadd.f32 %v566_v13, %v565_v8 }
 0x165   : > { %v610_v10 = vrot.slane %v609_v24, 1 }
 0x166   : > { %v590_v17 = vmax.f32 %v588_v38, %v589_v14  ;;  %v648_v18 = vadd.f32 %v647_v15, %v646_v53  ;;  %v569_v32 = vmul.f32 0.0078125, %v567_v35 }
 0x167   : > { %v611_v30 = vmin.f32 %v609_v24, %v610_v10 }
 0x168   : > { %790 = vmatprep.mubr.f32.mxu1 %v590_v17  ;;  %v649_v61 = vmul.f32 0.0078125, %v648_v18  ;;  %v650_v2 = vmul.f32 %v569_v32, %v569_v32 }
 0x169   : > { %791 = vmatmul.mubr.f32.vlgmr.msra.gmra.mxu1 %v569_v32 }
 0x16a   : > { %v651_v20 = vsub.f32 %v649_v61, %v650_v2 }
 0x16c   : > { %v652_v58 = vmax.f32 %v651_v20, 0.0 }
 0x16e   : > { %v653_v16 = vadd.f32 1e-05, %v652_v58 }
 0x170   : > { %1752 = vrsqrt.f32 %v653_v16  ;;  %vm656_vm0 = vcmp.eq.f32.partialorder %v653_v16, inf  ;;  %v659_v27 = vand.u32 2147483648, %v653_v16  ;;  %vm658_vm1 = vcmp.eq.f32.partialorder %v653_v16, 0.0 }
 0x17d   : > { %v1753_v25 = vpop.eup %1752 }
 0x17e   : > { %v655_v26 = vmul.f32 %v1753_v25, %v653_v16 }
 0x180   : > { %v657_v28 = vsel %vm656_vm0, %v653_v16, %v655_v26 }
 0x181   : > { %v660_v29 = vsel %vm658_vm1, %v659_v27, %v657_v28 }
 0x182   : > { %860 = vmatprep.mubr.f32.mxu0 %v660_v29 }
 0x183   : > { %861 = vmatmul.mubr.f32.vlgmr.msra.gmra.mxu0 %v611_v30 }
 0x229   : > { %v1437_v31 = vpop.f32.mrf.mxu1 }
 0x22b   : > { %v1438_v34 = vpop.f32.mrf.mxu1 }
 0x22c   : > { %v1439_v36 = vadd.f32 %v1438_v34, %v1437_v31 }
 0x22e   : > { %v793_v41 = vadd.f32 %v1439_v36, %v725_v37 }
 0x243   : > { %v1472_v39 = vpop.f32.mrf.mxu0 }
 0x245   : > { %v1473_v40 = vpop.f32.mrf.mxu0 }
 0x246   : > { %v1474_v43 = vadd.f32 %v1473_v40, %v1472_v39 }
 0x248   : > { %v863_v44 = vadd.f32 %v1474_v43, %v793_v41 }
 0x24a   : > { %866 = vst [vmem:[#allocation2] sm:$0x1] %v863_v44 }
 0x24b PF: > { %v892_v46 = vld [vmem:[#allocation8 + $0x78] sm:$0xff]  ;;  %v891_v47 = vld [vmem:[#allocation8 + $0x70] sm:$0xff]  ;;  %s1364_s21 = sshll.u32 %s2010_s9, 6  ;;  %v1940_v48 = vmov 0   ;;  %v890_v49 = vld [vmem:[#allocation8 + $0x68] sm:$0xff]  ;;  %s1372_s19 = sshll.u32 %s2010_s9, 10 }
 0x24c   : > { %1579 = vmatprep.subr.mxu0 %v892_v46  ;;  %1754 = vset.pattern.permute.xlu0 %v1940_v48  ;;  %s2249_s10 = scalar_lea.vmem %s2361_s0, %s1364_s21  ;;  %v889_v51 = vld [vmem:[#allocation8 + $0x60] sm:$0xff]  ;;  %v888_v54 = vld [vmem:[#allocation8 + $0x58] sm:$0xff]  ;;  %v887_v55 = vld [vmem:[#allocation8 + $0x50] sm:$0xff]  ;;  %s1243_s22 = sshll.u32 %s2120_s12, 4  ;;  %s2314_s22 = int_to_ptr.vmem [resolvable:$true] %s1243_s22 }
 0x24d   : > { %1580 = vmatpush3.msra.mxu0 %v892_v46  ;;  %1755 = vset.pattern.permute.xlu1 %v1940_v48  ;;  %v2252_v52 = vld [vmem:[%s2249_s10] sm:$0xff]  ;;  %v1007_v57 = vld [vmem:[%s2118_s25 + $0x10] sm:$0xff]  ;;  %v1006_v60 = vld [vmem:[%s2118_s25 + $0x8] sm:$0xff]  ;;  %s2312_s24 = scalar_lea.hbm %s2369_s8, %s1372_s19  ;;  %s2321_s9 = scalar_lea.sflag [#allocation5], %s356_s17 }
 0x24e   : > { %1581 = vmatprep.subr.mxu0 %v891_v47  ;;  %1611 = vmatprep.mubr.f32.mxu0 %v2252_v52  ;;  %v1005_v56 = vld [vmem:[%s2118_s25] sm:$0xff]  ;;  %v886_v59 = vld [vmem:[#allocation8 + $0x48] sm:$0xff]  ;;  %v1008_v63 = vld [vmem:[%s2118_s25 + $0x18] sm:$0xff]  ;;  %s1860_s21 = scalar_lea.vmem %s2314_s22, 1024  ;;  %s1941_s20 = smov [#allocation11]  }
 0x24f   : > { %1582 = vmatpush3.msra.mxu0 %v891_v47  ;;  %1015 = vperm.xlu0 %1754, %v1005_v56   ;;  %v1076_v62 = vld [vmem:[#allocation9 + $0x78] sm:$0xff]  ;;  %v885_v0 = vld [vmem:[#allocation8 + $0x40] sm:$0xff]  ;;  %v1075_v1 = vld [vmem:[#allocation9 + $0x70] sm:$0xff]  ;;  %p1861_p10 = scmp.ne.s32.totalorder %s2314_s22, %s1860_s21  ;;  %s1864_s26 = sshll.u32 %s1941_s20, 4  ;;  %s1865_s26 = int_to_ptr.vmem [resolvable:$false] %s1864_s26 }
 0x250   : > { %1583 = vmatprep.subr.mxu0 %v890_v49  ;;  %1025 = vperm.xlu1 %1755, %v1007_v57   ;;  %v884_v3 = vld [vmem:[#allocation8 + $0x38] sm:$0xff]  ;;  %v1010_v6 = vld [vmem:[%s2118_s25 + $0x28] sm:$0xff]  ;;  %v883_v7 = vld [vmem:[#allocation8 + $0x30] sm:$0xff]  ;;  %p1867_p9 = scmp.lt.s32.totalorder %s2314_s22, %s1865_s26 }
 0x251   : > { %1584 = vmatpush3.msra.mxu0 %v890_v49  ;;  %1623 = vmatprep.subr.mxu1 %v1076_v62  ;;  %v1009_v4 = vld [vmem:[%s2118_s25 + $0x20] sm:$0xff]  ;;  %v1074_v8 = vld [vmem:[#allocation9 + $0x68] sm:$0xff]  ;;  %v1012_v38 = vld [vmem:[%s2118_s25 + $0x38] sm:$0xff]  ;;  %p1862_p0 = pnand %p1861_p10, %p2027_p5 }
 0x252   : > { %1585 = vmatprep.subr.mxu0 %v889_v51  ;;  %1624 = vmatpush3.msra.mxu1 %v1076_v62  ;;  %v882_v9 = vld [vmem:[#allocation8 + $0x28] sm:$0xff]  ;;  %v881_v53 = vld [vmem:[#allocation8 + $0x20] sm:$0xff]  ;;  %v880_v13 = vld [vmem:[#allocation8 + $0x18] sm:$0xff] }
 0x253   : > { %1586 = vmatpush3.msra.mxu0 %v889_v51  ;;  %1020 = vperm.xlu0 %1754, %v1006_v60   ;;  %v1011_v11 = vld [vmem:[%s2118_s25 + $0x30] sm:$0xff]  ;;  %v1073_v12 = vld [vmem:[#allocation9 + $0x60] sm:$0xff]  ;;  %v1072_v33 = vld [vmem:[#allocation9 + $0x58] sm:$0xff]  ;;  %p1863_p8 = pneg %p1862_p0 }
 0x254   : > { %1587 = vmatprep.subr.mxu0 %v888_v54  ;;  %1030 = vperm.xlu1 %1755, %v1008_v63   ;;  %v879_v45 = vld [vmem:[#allocation8 + $0x10] sm:$0xff]  ;;  %v878_v15 = vld [vmem:[#allocation8 + $0x8] sm:$0xff]  ;;  %v877_v50 = vld [vmem:[#allocation8] sm:$0xff] }
 0x255   : > { %1588 = vmatpush3.msra.mxu0 %v888_v54  ;;  %1625 = vmatprep.subr.mxu1 %v1075_v1  ;;  %v1071_v14 = vld [vmem:[#allocation9 + $0x50] sm:$0xff]  ;;  %v1070_v35 = vld [vmem:[#allocation9 + $0x48] sm:$0xff]  ;;  %v1069_v5 = vld [vmem:[#allocation9 + $0x40] sm:$0xff] }
 0x256   : > { %1589 = vmatprep.subr.mxu0 %v887_v55  ;;  %1626 = vmatpush3.msra.mxu1 %v1075_v1  ;;  %v2264_v17 = vld [vmem:[%s2249_s10 + $0x8] sm:$0xff]  ;;  %v1068_v18 = vld [vmem:[#allocation9 + $0x38] sm:$0xff]  ;;  %v2267_v32 = vld [vmem:[%s2249_s10 + $0x10] sm:$0xff] }
 0x257   : > { %1590 = vmatpush3.msra.mxu0 %v887_v55  ;;  %1035 = vperm.xlu0 %1754, %v1009_v4   ;;  %v1067_v42 = vld [vmem:[#allocation9 + $0x30] sm:$0xff]  ;;  %v1066_v2 = vld [vmem:[#allocation9 + $0x28] sm:$0xff]  ;;  %v2275_v19 = vld [vmem:[%s2249_s10 + $0x20] sm:$0xff] }
 0x258   : > { %1591 = vmatprep.subr.mxu0 %v886_v59  ;;  %1040 = vperm.xlu1 %1755, %v1010_v6   ;;  %v2272_v61 = vld [vmem:[%s2249_s10 + $0x18] sm:$0xff]  ;;  %v1065_v20 = vld [vmem:[#allocation9 + $0x20] sm:$0xff]  ;;  %v2283_v21 = vld [vmem:[%s2249_s10 + $0x30] sm:$0xff] }
 0x259   : > { %1592 = vmatpush3.msra.mxu0 %v886_v59  ;;  %1627 = vmatprep.subr.mxu1 %v1074_v8  ;;  %v2280_v58 = vld [vmem:[%s2249_s10 + $0x28] sm:$0xff]  ;;  %v2288_v16 = vld [vmem:[%s2249_s10 + $0x38] sm:$0xff]  ;;  %v1365_v27 = vld [vmem:[#allocation2] ss:$0 sm:$0xff]  ;;  %s1866_s10 = scalar_lea.vmem %s1865_s26, 2048 }
 0x25a   : > { %1593 = vmatprep.subr.mxu0 %v885_v0  ;;  %1628 = vmatpush3.msra.mxu1 %v1074_v8  ;;  %v1064_v22 = vld [vmem:[#allocation9 + $0x18] sm:$0xff]  ;;  %v1063_v23 = vld [vmem:[#allocation9 + $0x10] sm:$0xff]  ;;  %v1062_v24 = vld [vmem:[#allocation9 + $0x8] sm:$0xff]  ;;  %p1868_p12 = scmp.lt.s32.totalorder %s1866_s10, %s1860_s21 }
 0x25b   : > { %1594 = vmatpush3.msra.mxu0 %v885_v0  ;;  %1045 = vperm.xlu0 %1754, %v1011_v11   ;;  %v1061_v25 = vld [vmem:[#allocation9] sm:$0xff] }
 0x25c   : > { %1595 = vmatprep.subr.mxu0 %v884_v3  ;;  %1050 = vperm.xlu1 %1755, %v1012_v38   ;;  %p1869_p1 = por %p1868_p12, %p1867_p9 }
 0x25d   : > { %1596 = vmatpush3.msra.mxu0 %v884_v3  ;;  %1629 = vmatprep.subr.mxu1 %v1073_v12 }
 0x25e   : > { %1597 = vmatprep.subr.mxu0 %v883_v7  ;;  %1630 = vmatpush3.msra.mxu1 %v1073_v12  ;;  %p1870_p2 = pnand %p1869_p1, %p1863_p8 }
 0x25f   : > { %1598 = vmatpush3.msra.mxu0 %v883_v7  ;;  %1631 = vmatprep.subr.mxu1 %v1072_v33  ;;  %v1366_v7 = vld [vmem:[%s2368_s7] ss:$0 sm:$0xff] }
 0x260   : > { %1599 = vmatprep.subr.mxu0 %v882_v9  ;;  %1632 = vmatpush3.msra.mxu1 %v1072_v33 }
 0x261   : > { %1600 = vmatpush3.msra.mxu0 %v882_v9  ;;  %1633 = vmatprep.subr.mxu1 %v1071_v14 }
 0x262   : > { %1601 = vmatprep.subr.mxu0 %v881_v53  ;;  %1634 = vmatpush3.msra.mxu1 %v1071_v14 }
 0x263   : > { %1602 = vmatpush3.msra.mxu0 %v881_v53  ;;  %1635 = vmatprep.subr.mxu1 %v1070_v35 }
 0x264   : > { %1603 = vmatprep.subr.mxu0 %v880_v13  ;;  %1636 = vmatpush3.msra.mxu1 %v1070_v35 }
 0x265   : > { %1604 = vmatpush3.msra.mxu0 %v880_v13  ;;  %1637 = vmatprep.subr.mxu1 %v1069_v5 }
 0x266   : > { %1605 = vmatprep.subr.mxu0 %v879_v45  ;;  %1638 = vmatpush3.msra.mxu1 %v1069_v5 }
 0x267   : > { %1606 = vmatpush3.msra.mxu0 %v879_v45  ;;  %1639 = vmatprep.subr.mxu1 %v1068_v18 }
 0x268   : > { %1607 = vmatprep.subr.mxu0 %v878_v15  ;;  %1640 = vmatpush3.msra.mxu1 %v1068_v18 }
 0x269   : > { %1608 = vmatpush3.msra.mxu0 %v878_v15  ;;  %1641 = vmatprep.subr.mxu1 %v1067_v42 }
 0x26a   : > { %1609 = vmatprep.subr.mxu0 %v877_v50  ;;  %1642 = vmatpush3.msra.mxu1 %v1067_v42 }
 0x26b   : > { %1610 = vmatpush3.msra.mxu0 %v877_v50  ;;  %1643 = vmatprep.subr.mxu1 %v1066_v2 }
 0x26c   : > { %1612 = vmatmul.mubr.f32.vlgmr.msra.gmra.mxu0 %v2264_v17  ;;  %1644 = vmatpush3.msra.mxu1 %v1066_v2 }
 0x26d   : > { %1614 = vmatprep.mubr.f32.mxu0 %v2267_v32  ;;  %1645 = vmatprep.subr.mxu1 %v1065_v20 }
 0x26e   : > { %1646 = vmatpush3.msra.mxu1 %v1065_v20 }
 0x26f   : > { %1647 = vmatprep.subr.mxu1 %v1064_v22 }
 0x270   : > { %1615 = vmatmul.mubr.f32.gmra.mxu0 %v2272_v61  ;;  %1648 = vmatpush3.msra.mxu1 %v1064_v22 }
 0x271   : > { %1617 = vmatprep.mubr.f32.mxu0 %v2275_v19  ;;  %1649 = vmatprep.subr.mxu1 %v1063_v23 }
 0x272   : > { %1650 = vmatpush3.msra.mxu1 %v1063_v23 }
 0x273   : > { %1651 = vmatprep.subr.mxu1 %v1062_v24 }
 0x274   : > { %1618 = vmatmul.mubr.f32.gmra.mxu0 %v2280_v58  ;;  %1652 = vmatpush3.msra.mxu1 %v1062_v24 }
 0x275   : > { %1620 = vmatprep.mubr.f32.mxu0 %v2283_v21  ;;  %1653 = vmatprep.subr.mxu1 %v1061_v25 }
 0x276   : > { %1654 = vmatpush3.msra.mxu1 %v1061_v25 }
 0x278   : > { %1621 = vmatmul.mubr.f32.gmra.mxu0 %v2288_v16 }
 0x2ca   : > { %v1016_v10 = vpop.permute.xlu0 %1015 }
 0x2cb   : > { %v1026_v26 = vpop.permute.xlu1 %1025 }
 0x2ce   : > { %v1021_v34 = vpop.permute.xlu0 %1020 }
 0x2cf   : > { %v1031_v37 = vpop.permute.xlu1 %1030 }
 0x2d2   : > { %v1036_v48 = vpop.permute.xlu0 %1035 }
 0x2d3   : > { %v1041_v55 = vpop.permute.xlu1 %1040 }
 0x2d6   : > { %v1046_v1 = vpop.permute.xlu0 %1045 }
 0x2d7   : > { %v1051_v3 = vpop.permute.xlu1 %1050 }
 0x32c   : > { %v1613_v28 = vpop.f32.mrf.mxu0 }
 0x32d   : > { %v972_v29 = vadd.f32 %v1613_v28, %v1365_v27 }
 0x32e   : > { %v966_v30 = vpop.f32.mrf.mxu0 }
 0x32f   : > { %v967_v31 = vadd.f32 %v1365_v27, %v966_v30  ;;  %v1054_v40 = vmul.f32 %v1021_v34, %v972_v29 }
 0x330   : > { %v1616_v36 = vpop.f32.mrf.mxu0 }
 0x331   : > { %v1053_v39 = vmul.f32 %v1016_v10, %v967_v31  ;;  %v982_v41 = vadd.f32 %v1616_v36, %v1365_v27 }
 0x332   : > { %v976_v43 = vpop.f32.mrf.mxu0 }
 0x333   : > { %v977_v44 = vadd.f32 %v1365_v27, %v976_v43  ;;  %1655 = vmatprep.mubr.f32.mxu1 %v1053_v39  ;;  %v1056_v49 = vmul.f32 %v1031_v37, %v982_v41 }
 0x334   : > { %v1619_v46 = vpop.f32.mrf.mxu0  ;;  %1656 = vmatmul.mubr.f32.vlgmr.msra.gmra.mxu1 %v1054_v40 }
 0x335   : > { %v1055_v47 = vmul.f32 %v1026_v26, %v977_v44  ;;  %v992_v51 = vadd.f32 %v1619_v46, %v1365_v27 }
 0x336   : > { %v986_v54 = vpop.f32.mrf.mxu0 }
 0x337   : > { %v987_v56 = vadd.f32 %v1365_v27, %v986_v54  ;;  %1658 = vmatprep.mubr.f32.mxu1 %v1055_v47  ;;  %v1058_v60 = vmul.f32 %v1041_v55, %v992_v51 }
 0x338   : > { %v1622_v57 = vpop.f32.mrf.mxu0  ;;  %1659 = vmatmul.mubr.f32.gmra.mxu1 %v1056_v49 }
 0x339   : > { %v1057_v59 = vmul.f32 %v1036_v48, %v987_v56  ;;  %v1002_v62 = vadd.f32 %v1622_v57, %v1365_v27 }
 0x33a   : > { %v996_v63 = vpop.f32.mrf.mxu0 }
 0x33b   : > { %v997_v0 = vadd.f32 %v1365_v27, %v996_v63  ;;  %1661 = vmatprep.mubr.f32.mxu1 %v1057_v59  ;;  %v1060_v6 = vmul.f32 %v1051_v3, %v1002_v62 }
 0x33c   : > { %1662 = vmatmul.mubr.f32.gmra.mxu1 %v1058_v60 }
 0x33d   : > { %v1059_v4 = vmul.f32 %v1046_v1, %v997_v0 }
 0x33f   : > { %1664 = vmatprep.mubr.f32.mxu1 %v1059_v4 }
 0x340   : > { %1665 = vmatmul.mubr.f32.gmra.mxu1 %v1060_v6 }
 0x3f4   : > { %v1657_v8 = vpop.f32.mrf.mxu1 }
 0x3f5   : > { %v1156_v9 = vadd.f32 %v1657_v8, %v1366_v7 }
 0x3f6   : > { %v1150_v11 = vpop.f32.mrf.mxu1 }
 0x3f7   : > { %vm1190_vm2 = vcmp.ge.f32.partialorder %v1156_v9, 0.0  ;;  %v1198_v38 = vmul.f32 0.01, %v1156_v9  ;;  %v1151_v53 = vadd.f32 %v1366_v7, %v1150_v11 }
 0x3f8   : > { %v1660_v12 = vpop.f32.mrf.mxu1 }
 0x3f9   : > { %v1206_v13 = vsel %vm1190_vm2, %v1156_v9, %v1198_v38  ;;  %vm1189_vm3 = vcmp.ge.f32.partialorder %v1151_v53, 0.0  ;;  %v1197_v33 = vmul.f32 0.01, %v1151_v53  ;;  %v1166_v45 = vadd.f32 %v1660_v12, %v1366_v7 }
 0x3fa   : > { %v1214_v14 = vadd.f32 %v1206_v13, %v2264_v17  ;;  %v1160_v15 = vpop.f32.mrf.mxu1 }
 0x3fb   : > { %v1205_v35 = vsel %vm1189_vm3, %v1151_v53, %v1197_v33  ;;  %vm1192_vm4 = vcmp.ge.f32.partialorder %v1166_v45, 0.0  ;;  %v1200_v50 = vmul.f32 0.01, %v1166_v45  ;;  %v1161_v5 = vadd.f32 %v1366_v7, %v1160_v15 }
 0x3fc   : > { %1222 = vst [vmem:[%s2120_s12 + $0x8] sm:$0xff] %v1214_v14  ;;  %v1213_v18 = vadd.f32 %v1205_v35, %v2252_v52  ;;  %v1663_v42 = vpop.f32.mrf.mxu1 }
 0x3fd   : > { %v1208_v2 = vsel %vm1192_vm4, %v1166_v45, %v1200_v50  ;;  %vm1191_vm5 = vcmp.ge.f32.partialorder %v1161_v5, 0.0  ;;  %v1199_v20 = vmul.f32 0.01, %v1161_v5  ;;  %v1176_v22 = vadd.f32 %v1663_v42, %v1366_v7 }
 0x3fe   : > { %1221 = vst [vmem:[%s2120_s12] sm:$0xff] %v1213_v18  ;;  %v1216_v23 = vadd.f32 %v1208_v2, %v2272_v61  ;;  %v1170_v24 = vpop.f32.mrf.mxu1 }
 0x3ff   : > { %v1207_v17 = vsel %vm1191_vm5, %v1161_v5, %v1199_v20  ;;  %vm1194_vm6 = vcmp.ge.f32.partialorder %v1176_v22, 0.0  ;;  %v1202_v25 = vmul.f32 0.01, %v1176_v22  ;;  %v1171_v10 = vadd.f32 %v1366_v7, %v1170_v24 }
 0x400   : > { %1224 = vst [vmem:[%s2120_s12 + $0x18] sm:$0xff] %v1216_v23  ;;  %v1215_v26 = vadd.f32 %v1207_v17, %v2267_v32  ;;  %v1666_v52 = vpop.f32.mrf.mxu1 }
 0x401   : > { %v1210_v27 = vsel %vm1194_vm6, %v1176_v22, %v1202_v25  ;;  %vm1193_vm7 = vcmp.ge.f32.partialorder %v1171_v10, 0.0  ;;  %v1201_v28 = vmul.f32 0.01, %v1171_v10  ;;  %v1186_v29 = vadd.f32 %v1666_v52, %v1366_v7 }
 0x402   : > { %1223 = vst [vmem:[%s2120_s12 + $0x10] sm:$0xff] %v1215_v26  ;;  %v1218_v61 = vadd.f32 %v1210_v27, %v2280_v58  ;;  %v1180_v30 = vpop.f32.mrf.mxu1 }
 0x403   : > { %v1209_v31 = vsel %vm1193_vm7, %v1171_v10, %v1201_v28  ;;  %vm1196_vm8 = vcmp.ge.f32.partialorder %v1186_v29, 0.0  ;;  %v1204_v34 = vmul.f32 0.01, %v1186_v29  ;;  %v1181_v36 = vadd.f32 %v1366_v7, %v1180_v30 }
 0x404   : > { %1226 = vst [vmem:[%s2120_s12 + $0x28] sm:$0xff] %v1218_v61  ;;  %v1217_v32 = vadd.f32 %v1209_v31, %v2275_v19 }
 0x405   : > { %v1212_v37 = vsel %vm1196_vm8, %v1186_v29, %v1204_v34  ;;  %vm1195_vm9 = vcmp.ge.f32.partialorder %v1181_v36, 0.0  ;;  %v1203_v39 = vmul.f32 0.01, %v1181_v36 }
 0x406   : > { %1225 = vst [vmem:[%s2120_s12 + $0x20] sm:$0xff] %v1217_v32  ;;  %v1220_v58 = vadd.f32 %v1212_v37, %v2288_v16 }
 0x407   : > { %v1211_v40 = vsel %vm1195_vm9, %v1181_v36, %v1203_v39 }
 0x408   : > { %1228 = vst [vmem:[%s2120_s12 + $0x38] sm:$0xff] %v1220_v58  ;;  %v1219_v19 = vadd.f32 %v1211_v40, %v2283_v21 }
 0x40a   : > { %1227 = vst [vmem:[%s2120_s12 + $0x30] sm:$0xff] %v1219_v19 }
 0x40b   : > { %1873 = shalt.err (!%p1870_p2)
}
 0x40c   : > { %s1874_s17 = scalar_lea.hbm %s2312_s24, 1024  ;;  %s1878_s23 = scalar_lea.hbm %s2369_s8, 2048 }
 0x40d   : > { %p1875_p3 = scmp.ne.s32.totalorder %s2312_s24, %s1874_s17  ;;  %p1879_p11 = scmp.lt.s32.totalorder %s2312_s24, %s2369_s8 }
 0x40e   : > { %p1880_p13 = scmp.lt.s32.totalorder %s1878_s23, %s1874_s17 }
 0x40f   : > { %p1876_p4 = pnand %p1875_p3, %p2027_p5 }
 0x410   : > { %p1881_p10 = por %p1880_p13, %p1879_p11 }
 0x411   : > { %p1877_p7 = pneg %p1876_p4 }
 0x413   : > { %p1882_p0 = pnand %p1881_p10, %p1877_p7 }
 0x415   : > { %1885 = shalt.err (!%p1882_p0)
}
 0x416   : > { %s1942_s18 = smov 128   ;;  %s1943_s21 = smov 8  }
 0x417   : > { %1683 = dma.vmem_to_hbm [thread:$0]  (%p2027_p5), %s2314_s22, 1024, %s2312_s24, %s2321_s9, %s1942_s18, %s1942_s18, %s1943_s21  }
 0x418 PF: > { %p1710_p8 = scmp.ge.s32.totalorder %s1932_s30, 2  ;;  %s1258_s20 = sand.u32 1, %s1920_s27  }
 0x419   : > { %s1259_s26 = scalar_lea.sflag [#allocation5], %s1258_s20 }
 0x41a   : > { %p1699_p9 = pnand %p1710_p8, %p2031_p6 }
 0x41c   : > { %p1700_p12 = pneg %p1699_p9 }
 0x41e   : > { %1915 = dma.done.wait (%p1700_p12), %s1259_s26, 1024  }
 0x41f   : > { %1917 = vsyncadd (%p1700_p12), %s1259_s26, 4294966272  ;;  %p21_p1 = scmp.ge.s32.totalorder %s2014_s11, 4   ;;  %s2375_s27 = smov %s1924_s28 }
 0x420   : > { %s2376_s28 = smov %s1928_s29  ;;  %s2377_s29 = smov %s2025_s14 }
 0x421   : > { %s2378_s30 = smov %s2014_s11  ;;  %23 = sbr.rel (!%p21_p1) target bundleno = 6 (0x6), region = 109 }
 0x426   :  { %1264 = vsyncpa [#allocation4], 1 }
 0x427   :  { %1266 = vsyncpa [#allocation4 + $0x1], 1 }
 0x428   :  { %1267 = vsyncpa [#allocation7], 1 }
 0x429   :  { %1268 = vsyncpa [#allocation10], 1 }
 0x42a   :  { %1269 = vsyncpa [#allocation5], 1 }
 0x42b   :  { %1271 = vsyncpa [#allocation5 + $0x1], 1 }

</bundles_post_ra>
